<compile_context>
chip_gen: v5e
topology: v5e:2x2
jax: 0.10.0
libtpu: 0.0.40
codegen_flags: <defaults>
</compile_context>

<pallas_src>
import functools
import math

import jax
import jax.numpy as jnp
import numpy as np
from jax.experimental import pallas as pl
from jax.experimental.pallas import tpu as pltpu


# ----------------------------- kernel helpers -----------------------------

def _poly_mul_biquad(poly, a1, a2):
    # poly: list of (1, TM) coeff rows [p0, ..., pd]; multiply by
    # (1 + a1 z^-1 + a2 z^-2).  All ops are lane-dense VPU work.
    d = len(poly) - 1
    out = []
    for j in range(d + 3):
        acc = None
        for i in range(max(0, j - 2), min(j, d) + 1):
            k = j - i
            term = poly[i] if k == 0 else (poly[i] * a1 if k == 1 else poly[i] * a2)
            acc = term if acc is None else acc + term
        out.append(acc)
    return out


# ------------------------------- the kernel -------------------------------

def _encoder_kernel(h_ref, w_ref, b_ref, out_ref,
                    *, kv, kn, f0_min, f0_log_range, max_abs):
    # Transposed backbone Linear on the MXU:
    #   logits_T[c, m] = sum_d W[c, d] * h[m, d] + b[c]    -> (C, TM)
    # bf16 operands, f32 accumulation.  Channels on sublanes, rows lane-dense.
    # (Any Mosaic-inserted transpose sits on the small h block; do NOT move it
    #  to the wrapper -- that would add a full HBM pass of the big tensor.)
    logits_t = jax.lax.dot_general(
        w_ref[...], h_ref[...],
        dimension_numbers=(((1,), (1,)), ((), ())),
        preferred_element_type=jnp.float32) + b_ref[...]

    # Permuted logits channel layout (wrapper de-interleaves g1/g2):
    #   [ f0 | v_g1(kv) | v_g2(kv) | v_log_gain
    #        | n_g1(kn) | n_g2(kn) | n_log_gain ]
    # Output row layout (unchanged torch order):
    #   [ f0 | v_lpc(2kv) | v_gain | n_lpc(2kn) | n_gain ]
    vg_row = 1 + 2 * kv
    noff = 2 + 2 * kv
    ng_row = noff + 2 * kn

    # f0: exp(sigmoid(x)*range + log_min) == f0_min * exp(sigmoid(x)*range)
    f0_row = f0_min * jnp.exp(jax.nn.sigmoid(logits_t[0:1, :]) * f0_log_range)

    def lpc_rows(off, k):
        # One grouped tanh over the whole (2k, TM) block -> single EUP push.
        t = jnp.tanh(logits_t[off:off + 2 * k, :])
        # a1/a2 for all k sections at once on contiguous (k, TM) blocks.
        g1, g2 = t[:k, :], t[k:, :]
        a1 = (2.0 * max_abs) * g1
        a1_abs = jnp.abs(a1)
        a2 = 0.5 * ((2.0 - a1_abs) * g2 * max_abs + a1_abs)
        # Sequential monic-biquad polynomial product (k is small & static).
        poly = [jnp.ones_like(a1[0:1, :]), a1[0:1, :], a2[0:1, :]]
        for s in range(1, k):
            poly = _poly_mul_biquad(poly, a1[s:s + 1, :], a2[s:s + 1, :])
        # biquads2lpc drops the leading monic 1
        return jnp.concatenate(poly[1:], axis=0)          # (2k, TM)

    rows = [
        f0_row,
        lpc_rows(1, kv),
        jnp.exp(logits_t[vg_row:vg_row + 1, :]),
        lpc_rows(noff, kn),
        jnp.exp(logits_t[ng_row:ng_row + 1, :]),
    ]
    # Single unmasked full-tile store instead of five sliced sublane writes.
    out_ref[...] = jnp.concatenate(rows, axis=0)


# ------------------------------- wrapper -----------------------------------

def pulse_train_real_coeff_lpc_encoder(h, weight, bias, *,
                                       voice_lpc_order, noise_lpc_order,
                                       f0_min=80.0, f0_max=1000.0,
                                       max_abs_value=0.99, tile_m=8192,
                                       input_dtype=jnp.bfloat16):
    B, F, D = h.shape
    C = weight.shape[0]
    assert voice_lpc_order % 2 == 0 and noise_lpc_order % 2 == 0
    kv, kn = voice_lpc_order // 2, noise_lpc_order // 2
    assert C == 1 + voice_lpc_order + 1 + noise_lpc_order + 1

    M = B * F
    M128 = pl.cdiv(M, 128) * 128

    # Large row tile so each grid step moves ~1 MiB (amortizes the ~0.35 us
    # per-step overhead); clamp to the 128-rounded problem size.
    tile_m = max(128, min((int(tile_m) // 128) * 128, M128))
    # v7x has 2 TensorCores sharing the single "parallel" grid axis, and each
    # needs >= 2 steps for double-buffer overlap -> keep >= 4 grid steps when
    # the problem is large enough to afford it.
    if M128 // tile_m < 4 <= M128 // 128:
        tile_m = max(128, ((M128 // 4) // 128) * 128)
    M_pad = pl.cdiv(M, tile_m) * tile_m
    grid_m = M_pad // tile_m

    # Channel permutation: de-interleave g1/g2 within each LPC block so the
    # kernel computes a1/a2 for all sections on contiguous sublane blocks.
    perm = ([0]
            + [1 + 2 * s for s in range(kv)]           # voice g1
            + [2 + 2 * s for s in range(kv)]           # voice g2
            + [1 + 2 * kv]                             # voice log gain
            + [2 + 2 * kv + 2 * s for s in range(kn)]  # noise g1
            + [3 + 2 * kv + 2 * s for s in range(kn)]  # noise g2
            + [2 + 2 * kv + 2 * kn])                   # noise log gain
    perm = np.asarray(perm, np.int32)

    hf = h.reshape(M, D).astype(jnp.float32)
    if M_pad != M:
        hf = jnp.pad(hf, ((0, M_pad - M), (0, 0)))
    hf = hf.astype(input_dtype)                         # bf16: ~1.6x HBM roofline
    w = weight[perm, :].astype(input_dtype)             # (C, D), torch Linear layout
    b2 = bias[perm].reshape(C, 1).astype(jnp.float32)   # broadcast over lanes

    # Scoped-VMEM sizing: the (tile_m, D) h block lane-pads D=32 -> 128 lanes;
    # inputs/outputs are double-buffered; leave slack for in-kernel f32 temps.
    in_item = jnp.dtype(input_dtype).itemsize
    c_pad = pl.cdiv(C, 8) * 8
    vmem_need = (2 * tile_m * 128 * in_item            # h (x2 buffers, lane-padded)
                 + 6 * c_pad * tile_m * 4              # out slab x2 + f32 temporaries
                 + (2 << 20))                          # weights/bias/headroom
    vmem_limit = int(min(max(16 << 20, 2 * vmem_need), 40 << 20))

    kernel = functools.partial(
        _encoder_kernel, kv=kv, kn=kn,
        f0_min=float(f0_min),
        f0_log_range=math.log(f0_max) - math.log(f0_min),
        max_abs=float(max_abs_value))

    out = pl.pallas_call(
        kernel,
        out_shape=jax.ShapeDtypeStruct((C, M_pad), jnp.float32),
        grid_spec=pltpu.PrefetchScalarGridSpec(
            num_scalar_prefetch=0,
            grid=(grid_m,),
            in_specs=[
                pl.BlockSpec((tile_m, D), lambda i: (i, 0)),   # h rows (bf16)
                pl.BlockSpec((C, D), lambda i: (0, 0)),        # weight (resident)
                pl.BlockSpec((C, 1), lambda i: (0, 0)),        # bias   (resident)
            ],
            out_specs=pl.BlockSpec((C, tile_m), lambda i: (0, i)),  # lane-dense slab
        ),
        compiler_params=pltpu.CompilerParams(
            dimension_semantics=("parallel",),
            vmem_limit_bytes=vmem_limit),
        cost_estimate=pl.CostEstimate(
            flops=2 * M_pad * D * C,
            transcendentals=M_pad * (2 * kv + 2 * kn + 4),
            bytes_accessed=(M_pad * D * in_item + C * D * in_item
                            + C * 4 + C * M_pad * 4)),
    )(hf, w, b2)

    out = out[:, :M]                               # drop row padding
    vg_row = 1 + 2 * kv
    noff = 2 + 2 * kv
    ng_row = noff + 2 * kn

    f0 = out[0].reshape(B, F)
    vlpc = out[1:vg_row].T.reshape(B, F, 2 * kv)
    vgain = out[vg_row].reshape(B, F)
    nlpc = out[noff:ng_row].T.reshape(B, F, 2 * kn)
    ngain = out[ng_row].reshape(B, F)

    # matches torch: (f0_params, (), (voice_gain, voice_lpc), (noise_gain, noise_lpc), ())
    return ((f0,), (), (vgain, vlpc), (ngain, nlpc), ())


# --------------------------- pure-JAX reference -----------------------------

def _reference_forward(h, weight, bias, voice_lpc_order, noise_lpc_order,
                       f0_min=80.0, f0_max=1000.0, max_abs=0.99):
    B, F, _ = h.shape
    out = jnp.einsum('bfd,cd->bfc', h, weight) + bias
    splits = np.cumsum([1, voice_lpc_order, 1, noise_lpc_order, 1])[:-1]
    f0_logits, vl, vg, nl, ng = jnp.split(out, splits, axis=-1)
    log_min, log_max = math.log(f0_min), math.log(f0_max)
    f0 = jnp.exp(jax.nn.sigmoid(f0_logits) * (log_max - log_min) + log_min)[..., 0]

    def logits2lpc(l):
        l = l.reshape(B, F, -1, 2)
        a1 = 2.0 * jnp.tanh(l[..., 0]) * max_abs
        a2 = 0.5 * ((2.0 - jnp.abs(a1)) * jnp.tanh(l[..., 1]) * max_abs + jnp.abs(a1))
        n = a1.shape[-1]
        poly = jnp.stack([jnp.ones_like(a1[..., 0]), a1[..., 0], a2[..., 0]], -1)
        for k in range(1, n):
            bq = jnp.stack([jnp.ones_like(a1[..., k]), a1[..., k], a2[..., k]], -1)
            d = poly.shape[-1] - 1
            new = []
            for j in range(d + 3):
                acc = 0.0
                for i in range(max(0, j - 2), min(j, d) + 1):
                    acc = acc + poly[..., i] * bq[..., j - i]
                new.append(acc)
            poly = jnp.stack(new, -1)
        return poly[..., 1:]

    return ((f0,), (),
            (jnp.exp(vg[..., 0]), logits2lpc(vl)),
            (jnp.exp(ng[..., 0]), logits2lpc(nl)),
            ())


# ----------------------------------- main -----------------------------------

if __name__ == "__main__":
    key = jax.random.PRNGKey(0)
    B, F, D = 2, 8, 32
    voice_lpc_order, noise_lpc_order = 4, 4
    C = 1 + voice_lpc_order + 1 + noise_lpc_order + 1   # 11

    k_h, k_w, k_b = jax.random.split(key, 3)
    h = jax.random.normal(k_h, (B, F, D), jnp.float32)
    weight = jax.random.normal(k_w, (C, D), jnp.float32) * 0.1   # torch Linear (out, in)
    bias = jax.random.normal(k_b, (C,), jnp.float32) * 0.1

    out = pulse_train_real_coeff_lpc_encoder(
        h, weight, bias,
        voice_lpc_order=voice_lpc_order, noise_lpc_order=noise_lpc_order)
    jax.block_until_ready(out)

    # Reference uses the same bf16-quantized inputs the kernel feeds the MXU
    # (all accumulation / post-matmul math is f32 in both), so tolerances
    # stay tight while still validating the bf16-input fast path.
    hq = h.astype(jnp.bfloat16).astype(jnp.float32)
    wq = weight.astype(jnp.bfloat16).astype(jnp.float32)
    ref = _reference_forward(hq, wq, bias, voice_lpc_order, noise_lpc_order)

    pairs = [
        (out[0][0], ref[0][0]),            # f0
        (out[2][0], ref[2][0]),            # voice gain
        (out[2][1], ref[2][1]),            # voice lpc coeffs
        (out[3][0], ref[3][0]),            # noise gain
        (out[3][1], ref[3][1]),            # noise lpc coeffs
    ]
    for got, want in pairs:
        np.testing.assert_allclose(np.asarray(got), np.asarray(want),
                                   rtol=1e-2, atol=1e-3)

    print("KERNEL_OK")
</pallas_src>

<mosaic_0001>
module attributes {stable_mosaic.version = 11 : i64} {
  func.func @_encoder_kernel(%arg0: i32, %arg1: memref<128x32xbf16, #tpu.memory_space<vmem>>, %arg2: memref<11x32xbf16, #tpu.memory_space<vmem>>, %arg3: memref<11x1xf32, #tpu.memory_space<vmem>>, %arg4: memref<11x128xf32, #tpu.memory_space<vmem>>) attributes {dimension_semantics = [#tpu.dimension_semantics<parallel>], iteration_bounds = array<i64: 1>, scalar_prefetch = 0 : i64, scratch_operands = 0 : i64, tpu.core_type = #tpu.core_type<tc>, window_params = [{transform_indices = @transform_0, window_bounds = array<i64: 128, 32>}, {pipeline_mode = #tpu.pipeline_mode<synchronous>, transform_indices = @transform_1, window_bounds = array<i64: 11, 32>}, {pipeline_mode = #tpu.pipeline_mode<synchronous>, transform_indices = @transform_2, window_bounds = array<i64: 11, 1>}, {transform_indices = @transform_3, window_bounds = array<i64: 11, 128>}]} {
    %c0 = arith.constant 0 : index
    %c0_0 = arith.constant 0 : index
    %0 = vector.load %arg2[%c0, %c0_0] : memref<11x32xbf16, #tpu.memory_space<vmem>>, vector<11x32xbf16>
    %c0_1 = arith.constant 0 : index
    %c0_2 = arith.constant 0 : index
    %1 = vector.load %arg1[%c0_1, %c0_2] : memref<128x32xbf16, #tpu.memory_space<vmem>>, vector<128x32xbf16>
    %cst = arith.constant dense<0.000000e+00> : vector<11x128xf32>
    %2 = tpu.matmul %0, %1, %cst {dimension_numbers = #tpu.dot_dimension_numbers<[1], [1], [0], [0], [0, 0, 1, 0], [], []>} : vector<11x32xbf16>, vector<128x32xbf16>, vector<11x128xf32> -> vector<11x128xf32>
    %c0_3 = arith.constant 0 : index
    %c0_4 = arith.constant 0 : index
    %3 = vector.load %arg3[%c0_3, %c0_4] : memref<11x1xf32, #tpu.memory_space<vmem>>, vector<11x1xf32>
    %4 = vector.broadcast %3 : vector<11x1xf32> to vector<11x128xf32>
    %5 = arith.addf %2, %4 : vector<11x128xf32>
    %6 = vector.extract_strided_slice %5 {offsets = [0, 0], sizes = [1, 128], strides = [1, 1]} : vector<11x128xf32> to vector<1x128xf32>
    %7 = arith.negf %6 : vector<1x128xf32>
    %8 = math.exp %7 : vector<1x128xf32>
    %cst_5 = arith.constant 1.000000e+00 : f32
    %9 = vector.broadcast %cst_5 : f32 to vector<1x128xf32>
    %10 = arith.addf %9, %8 : vector<1x128xf32>
    %11 = arith.divf %9, %10 : vector<1x128xf32>
    %cst_6 = arith.constant 2.5257287 : f32
    %12 = vector.broadcast %cst_6 : f32 to vector<1x128xf32>
    %13 = arith.mulf %11, %12 : vector<1x128xf32>
    %14 = math.exp %13 : vector<1x128xf32>
    %cst_7 = arith.constant 8.000000e+01 : f32
    %15 = vector.broadcast %cst_7 : f32 to vector<1x128xf32>
    %16 = arith.mulf %15, %14 : vector<1x128xf32>
    %17 = vector.extract_strided_slice %5 {offsets = [1, 0], sizes = [4, 128], strides = [1, 1]} : vector<11x128xf32> to vector<4x128xf32>
    %18 = math.tanh %17 : vector<4x128xf32>
    %19 = vector.extract_strided_slice %18 {offsets = [0, 0], sizes = [2, 128], strides = [1, 1]} : vector<4x128xf32> to vector<2x128xf32>
    %20 = vector.extract_strided_slice %18 {offsets = [2, 0], sizes = [2, 128], strides = [1, 1]} : vector<4x128xf32> to vector<2x128xf32>
    %cst_8 = arith.constant 1.980000e+00 : f32
    %21 = vector.broadcast %cst_8 : f32 to vector<2x128xf32>
    %22 = arith.mulf %21, %19 : vector<2x128xf32>
    %23 = math.absf %22 : vector<2x128xf32>
    %cst_9 = arith.constant 2.000000e+00 : f32
    %24 = vector.broadcast %cst_9 : f32 to vector<2x128xf32>
    %25 = arith.subf %24, %23 : vector<2x128xf32>
    %26 = arith.mulf %25, %20 : vector<2x128xf32>
    %cst_10 = arith.constant 9.900000e-01 : f32
    %27 = vector.broadcast %cst_10 : f32 to vector<2x128xf32>
    %28 = arith.mulf %26, %27 : vector<2x128xf32>
    %29 = arith.addf %28, %23 : vector<2x128xf32>
    %cst_11 = arith.constant 5.000000e-01 : f32
    %30 = vector.broadcast %cst_11 : f32 to vector<2x128xf32>
    %31 = arith.mulf %30, %29 : vector<2x128xf32>
    %cst_12 = arith.constant 1.000000e+00 : f32
    %32 = vector.broadcast %cst_12 : f32 to vector<1x128xf32>
    %33 = vector.extract_strided_slice %22 {offsets = [0, 0], sizes = [1, 128], strides = [1, 1]} : vector<2x128xf32> to vector<1x128xf32>
    %34 = vector.extract_strided_slice %31 {offsets = [0, 0], sizes = [1, 128], strides = [1, 1]} : vector<2x128xf32> to vector<1x128xf32>
    %35 = vector.extract_strided_slice %22 {offsets = [1, 0], sizes = [1, 128], strides = [1, 1]} : vector<2x128xf32> to vector<1x128xf32>
    %36 = vector.extract_strided_slice %31 {offsets = [1, 0], sizes = [1, 128], strides = [1, 1]} : vector<2x128xf32> to vector<1x128xf32>
    %37 = arith.mulf %32, %35 : vector<1x128xf32>
    %38 = arith.addf %37, %33 : vector<1x128xf32>
    %39 = arith.mulf %32, %36 : vector<1x128xf32>
    %40 = arith.mulf %33, %35 : vector<1x128xf32>
    %41 = arith.addf %39, %40 : vector<1x128xf32>
    %42 = arith.addf %41, %34 : vector<1x128xf32>
    %43 = arith.mulf %33, %36 : vector<1x128xf32>
    %44 = arith.mulf %34, %35 : vector<1x128xf32>
    %45 = arith.addf %43, %44 : vector<1x128xf32>
    %46 = arith.mulf %34, %36 : vector<1x128xf32>
    %47 = tpu.concatenate %38, %42, %45, %46 in 0 : vector<1x128xf32>, vector<1x128xf32>, vector<1x128xf32>, vector<1x128xf32> -> vector<4x128xf32>
    %48 = vector.extract_strided_slice %5 {offsets = [5, 0], sizes = [1, 128], strides = [1, 1]} : vector<11x128xf32> to vector<1x128xf32>
    %49 = math.exp %48 : vector<1x128xf32>
    %50 = vector.extract_strided_slice %5 {offsets = [6, 0], sizes = [4, 128], strides = [1, 1]} : vector<11x128xf32> to vector<4x128xf32>
    %51 = math.tanh %50 : vector<4x128xf32>
    %52 = vector.extract_strided_slice %51 {offsets = [0, 0], sizes = [2, 128], strides = [1, 1]} : vector<4x128xf32> to vector<2x128xf32>
    %53 = vector.extract_strided_slice %51 {offsets = [2, 0], sizes = [2, 128], strides = [1, 1]} : vector<4x128xf32> to vector<2x128xf32>
    %cst_13 = arith.constant 1.980000e+00 : f32
    %54 = vector.broadcast %cst_13 : f32 to vector<2x128xf32>
    %55 = arith.mulf %54, %52 : vector<2x128xf32>
    %56 = math.absf %55 : vector<2x128xf32>
    %cst_14 = arith.constant 2.000000e+00 : f32
    %57 = vector.broadcast %cst_14 : f32 to vector<2x128xf32>
    %58 = arith.subf %57, %56 : vector<2x128xf32>
    %59 = arith.mulf %58, %53 : vector<2x128xf32>
    %cst_15 = arith.constant 9.900000e-01 : f32
    %60 = vector.broadcast %cst_15 : f32 to vector<2x128xf32>
    %61 = arith.mulf %59, %60 : vector<2x128xf32>
    %62 = arith.addf %61, %56 : vector<2x128xf32>
    %cst_16 = arith.constant 5.000000e-01 : f32
    %63 = vector.broadcast %cst_16 : f32 to vector<2x128xf32>
    %64 = arith.mulf %63, %62 : vector<2x128xf32>
    %cst_17 = arith.constant 1.000000e+00 : f32
    %65 = vector.broadcast %cst_17 : f32 to vector<1x128xf32>
    %66 = vector.extract_strided_slice %55 {offsets = [0, 0], sizes = [1, 128], strides = [1, 1]} : vector<2x128xf32> to vector<1x128xf32>
    %67 = vector.extract_strided_slice %64 {offsets = [0, 0], sizes = [1, 128], strides = [1, 1]} : vector<2x128xf32> to vector<1x128xf32>
    %68 = vector.extract_strided_slice %55 {offsets = [1, 0], sizes = [1, 128], strides = [1, 1]} : vector<2x128xf32> to vector<1x128xf32>
    %69 = vector.extract_strided_slice %64 {offsets = [1, 0], sizes = [1, 128], strides = [1, 1]} : vector<2x128xf32> to vector<1x128xf32>
    %70 = arith.mulf %65, %68 : vector<1x128xf32>
    %71 = arith.addf %70, %66 : vector<1x128xf32>
    %72 = arith.mulf %65, %69 : vector<1x128xf32>
    %73 = arith.mulf %66, %68 : vector<1x128xf32>
    %74 = arith.addf %72, %73 : vector<1x128xf32>
    %75 = arith.addf %74, %67 : vector<1x128xf32>
    %76 = arith.mulf %66, %69 : vector<1x128xf32>
    %77 = arith.mulf %67, %68 : vector<1x128xf32>
    %78 = arith.addf %76, %77 : vector<1x128xf32>
    %79 = arith.mulf %67, %69 : vector<1x128xf32>
    %80 = tpu.concatenate %71, %75, %78, %79 in 0 : vector<1x128xf32>, vector<1x128xf32>, vector<1x128xf32>, vector<1x128xf32> -> vector<4x128xf32>
    %81 = vector.extract_strided_slice %5 {offsets = [10, 0], sizes = [1, 128], strides = [1, 1]} : vector<11x128xf32> to vector<1x128xf32>
    %82 = math.exp %81 : vector<1x128xf32>
    %83 = tpu.concatenate %16, %47, %49, %80, %82 in 0 : vector<1x128xf32>, vector<4x128xf32>, vector<1x128xf32>, vector<4x128xf32>, vector<1x128xf32> -> vector<11x128xf32>
    %c0_18 = arith.constant 0 : index
    %c0_19 = arith.constant 0 : index
    %84 = vector.load %arg4[%c0_18, %c0_19] : memref<11x128xf32, #tpu.memory_space<vmem>>, vector<11x128xf32>
    tpu.vector_store %arg4[%c0_18, %c0_19], %83 {strides = array<i32>} : memref<11x128xf32, #tpu.memory_space<vmem>>, vector<11x128xf32>,
    return
  }
  func.func @transform_0(%arg0: i32) -> (i32, i32) {
    %c0_i32 = arith.constant 0 : i32
    %c0_i32_0 = arith.constant 0 : i32
    return %arg0, %c0_i32 : i32, i32
  }
  func.func @transform_1(%arg0: i32) -> (i32, i32) {
    %c0_i32 = arith.constant 0 : i32
    %c0_i32_0 = arith.constant 0 : i32
    %c0_i32_1 = arith.constant 0 : i32
    return %c0_i32, %c0_i32_0 : i32, i32
  }
  func.func @transform_2(%arg0: i32) -> (i32, i32) {
    %c0_i32 = arith.constant 0 : i32
    %c0_i32_0 = arith.constant 0 : i32
    %c0_i32_1 = arith.constant 0 : i32
    return %c0_i32, %c0_i32_0 : i32, i32
  }
  func.func @transform_3(%arg0: i32) -> (i32, i32) {
    %c0_i32 = arith.constant 0 : i32
    %c0_i32_0 = arith.constant 0 : i32
    return %c0_i32, %arg0 : i32, i32
  }
}

</mosaic_0001>

<bundles_post_ra>
// kernel: tpu_custom_call.1
= control target key start
LH: loop header
LB: loop body
LE: loop exit
PB: predicated region body
PF: predicated region fallthrough
CT: control target
= control target key end

     0   :  { %vm90_vm0 = vcmask 261120   ;;  %s450_s0 = inlined_call_operand.vmem [shape: bf16[128,32], index: 0, kind: input, shape index: {}]   ;;  %s451_s1 = inlined_call_operand.vmem [shape: bf16[11,32], index: 1, kind: input, shape index: {}]   ;;  %s452_s2 = inlined_call_operand.vmem [shape: f32[11,1], index: 2, kind: input, shape index: {}]   ;;  %s453_s3 = inlined_call_operand.hbm [shape: f32[11,128], index: 3, kind: output, shape index: {}]  }
   0x1   :  { %v320_v0 = vld [vmem:[%s450_s0 + $0x38] sm:$0xff] }
   0x2   :  { %8 = vsyncpa [#allocation3], 0  ;;  %v116_v1 = vsel %vm90_vm0, %v320_v0, 0  ;;  %v319_v2 = vld [vmem:[%s450_s0 + $0x30] sm:$0xff]  ;;  %v318_v4 = vld [vmem:[%s450_s0 + $0x28] sm:$0xff]  ;;  %v366_v11 = vmov 0  }
   0x3   :  { %118 = vmatpush.bf16.xpose.msra.mxu0 %v116_v1  ;;  %v113_v3 = vsel %vm90_vm0, %v319_v2, 0  ;;  %v110_v5 = vsel %vm90_vm0, %v318_v4, 0  ;;  %v317_v6 = vld [vmem:[%s450_s0 + $0x20] sm:$0xff]  ;;  %v316_v8 = vld [vmem:[%s450_s0 + $0x18] sm:$0xff]  ;;  %325 = vset.pattern.permute.xlu0 %v366_v11  ;;  %v315_v12 = vld [vmem:[%s450_s0 + $0x10] sm:$0xff]  ;;  %vm199_vm1 = vcmask 1040384  }
   0x4   :  { %v107_v7 = vsel %vm90_vm0, %v317_v6, 0  ;;  %v104_v9 = vsel %vm90_vm0, %v316_v8, 0  ;;  %v33_v10 = vld [vmem:[%s452_s2] sm:$0xff]  ;;  %v101_v13 = vsel %vm90_vm0, %v315_v12, 0  ;;  %v34_v14 = vld [vmem:[%s452_s2 + $0x8] sm:$0x7] }
   0x5   :  { %37 = vperm.xlu0 %325, %v33_v10   ;;  %v314_v15 = vld [vmem:[%s450_s0 + $0x8] sm:$0xff]  ;;  %v313_v17 = vld [vmem:[%s450_s0] sm:$0xff]  ;;  %vm201_vm6 = vcmask 1041408   ;;  %vm203_vm7 = vcmask 1042432   ;;  %s367_s0 = smov [#allocation2]   ;;  %s262_s10 = sshll.u32 %s453_s3, 4  ;;  %s263_s10 = int_to_ptr.hbm [resolvable:$true] %s262_s10 }
   0x6   :  { %v98_v16 = vsel %vm90_vm0, %v314_v15, 0  ;;  %v95_v18 = vsel %vm90_vm0, %v313_v17, 0  ;;  %v276_v19 = vld [vmem:[%s451_s1] sm:$0xf]  ;;  %v312_v20 = vld [vmem:[%s451_s1] sm:$0x30] }
   0x7   :  { %v277_v21 = vor.u32 %v312_v20, %v276_v19  ;;  %s260_s1 = sshll.u32 %s367_s0, 4  ;;  %vm249_vm8 = vcmask 1044480   ;;  %vm251_vm9 = vcmask 1045504   ;;  %s368_s11 = smov 128   ;;  %s261_s1 = int_to_ptr.vmem [resolvable:$true] %s260_s1 }
   0x8   :  { %s369_s12 = smov 8  }
   0xb   :  { %119 = vmatpush.bf16.xpose.msra.mxu0 %v113_v3 }
   0xd   :  { %42 = vperm.xlu0 %325, %v34_v14  }
  0x13   :  { %120 = vmatpush.bf16.xpose.msra.mxu0 %v110_v5 }
  0x1b   :  { %121 = vmatpush.bf16.xpose.msra.mxu0 %v107_v7 }
  0x23   :  { %122 = vmatpush.bf16.xpose.msra.mxu0 %v104_v9 }
  0x2b   :  { %123 = vmatpush.bf16.xpose.msra.mxu0 %v101_v13 }
  0x33   :  { %124 = vmatpush.bf16.xpose.msra.mxu0 %v98_v16 }
  0x3b   :  { %125 = vmatpush.bf16.xpose.msra.mxu0 %v95_v18 }
  0x42   :  { %310 = vmatmul.msk.bf16.vlgmr.msra.gmra.mxu0 %vm90_vm0, %v277_v21 }
  0x77   :  { %v38_v22 = vpop.permute.xlu0 %37 }
  0x7f   :  { %v43_v26 = vpop.permute.xlu0 %42 }
  0xbf   :  { %v127_v23 = vpop.f32.mrf.mxu0 }
  0xc0   :  { %v435_v24 = vadd.f32 %v127_v23, %v38_v22 }
  0xc2   :  { %v311_v25 = vmul.f32 -1.442695, %v435_v24  ;;  %326 = vtanh.f32 %v435_v24  ;;  %v205_v22 = vmul.f32 1.442695, %v435_v24 }
  0xc4   :  { %328 = vpow2.f32 %v311_v25 }
  0xc7   :  { %v129_v27 = vpop.f32.mrf.mxu0 }
  0xc8   :  { %v327_v28 = vpop.eup %326  ;;  %v130_v29 = vadd.f32 %v129_v27, %v43_v26 }
  0xc9   :  { %v156_v30 = vmul.f32 1.98, %v327_v28  ;;  %v160_v34 = vrot.slane %v327_v28, 2 }
  0xca   :  { %v329_v31 = vpop.eup %328  ;;  %330 = vtanh.f32 %v130_v29  ;;  %v240_v59 = vmul.f32 1.442695, %v130_v29 }
  0xcb   :  { %v135_v32 = vadd.f32 1.0, %v329_v31  ;;  %v157_v33 = vand.u32 2147483647, %v156_v30  ;;  %v170_v36 = vrot.slane %v156_v30, 1  ;;  %v167_v47 = vrot.slane %v156_v30, 7 }
  0xcd   :  { %332 = vrcp.f32 %v135_v32  ;;  %v158_v35 = vsub.f32 2.0, %v157_v33  ;;  %v172_v41 = vmul.f32 %v170_v36, %v156_v30  ;;  %v145_v51 = vand.u32 2147483647, %v135_v32 }
  0xce   :  { %v147_v52 = vand.u32 2147483648, %v135_v32  ;;  %vm141_vm3 = vweird.f32 %v135_v32  ;;  %v169_v60 = vadd.f32 %v167_v47, %v156_v30  ;;  %334 = vpow2.f32 %v240_v59 }
  0xcf   :  { %v162_v38 = vmul.f32 %v160_v34, %v158_v35  ;;  %v174_v50 = vrot.slane %v172_v41, 7  ;;  %vm146_vm5 = vcmp.eq.f32.partialorder %v145_v51, 8.507059e+37 }
  0xd0   :  { %v331_v37 = vpop.eup %330  ;;  %v148_v1 = vor.u32 1.1754944e-38, %v147_v52  ;;  %v188_v13 = vrot.slane %v169_v60, 2  ;;  %v226_v17 = vrot.slane %v169_v60, 7 }
  0xd1   :  { %v209_v39 = vrot.slane %v331_v37, 2  ;;  %v163_v40 = vmul.f32 0.99, %v162_v38 }
  0xd3   :  { %v333_v42 = vpop.eup %332  ;;  %v211_v43 = vmul.f32 %v209_v39, %v158_v35  ;;  %v164_v45 = vadd.f32 %v163_v40, %v157_v33 }
  0xd4   :  { %v137_v44 = vmul.f32 %v333_v42, %v135_v32  ;;  %vm142_vm2 = vweird.f32 %v333_v42  ;;  %v335_v32 = vpop.eup %334 }
  0xd5   :  { %v212_v46 = vmul.f32 0.99, %v211_v43  ;;  %v165_v49 = vmul.f32 0.5, %v164_v45  ;;  %vm143_vm4 = vmor %vm141_vm3, %vm142_vm2 }
  0xd6   :  { %v138_v48 = vsub.f32 1.0, %v137_v44 }
  0xd7   :  { %v213_v53 = vadd.f32 %v212_v46, %v157_v33  ;;  %v176_v55 = vadd.f32 %v174_v50, %v165_v49  ;;  %v178_v56 = vrot.slane %v165_v49, 7  ;;  %v181_v57 = vrot.slane %v165_v49, 1 }
  0xd8   :  { %v139_v54 = vmul.f32 %v333_v42, %v138_v48  ;;  %v184_v0 = vmul.f32 %v170_v36, %v165_v49 }
  0xd9   :  { %v214_v58 = vmul.f32 0.5, %v213_v53  ;;  %v180_v62 = vadd.f32 %v178_v56, %v176_v55  ;;  %v183_v63 = vmul.f32 %v181_v57, %v156_v30  ;;  %v186_v20 = vmul.f32 %v181_v57, %v165_v49 }
  0xda   :  { %v140_v61 = vadd.f32 %v333_v42, %v139_v54 }
  0xdb   :  { %v215_v2 = vadd.f32 %v214_v58, %v174_v50  ;;  %v217_v3 = vrot.slane %v214_v58, 7  ;;  %v220_v4 = vrot.slane %v214_v58, 1  ;;  %v185_v6 = vadd.f32 %v184_v0, %v183_v63 }
  0xdc   :  { %v144_v5 = vsel %vm143_vm4, %v333_v42, %v140_v61  ;;  %v191_v7 = vrot.slane %v180_v62, 1  ;;  %v223_v9 = vmul.f32 %v214_v58, %v170_v36  ;;  %v197_v29 = vrot.slane %v186_v20, 6 }
  0xdd   :  { %v149_v8 = vsel %vm146_vm5, %v148_v1, %v144_v5  ;;  %v219_v10 = vadd.f32 %v217_v3, %v215_v2  ;;  %v222_v11 = vmul.f32 %v220_v4, %v156_v30  ;;  %v225_v14 = vmul.f32 %v220_v4, %v214_v58 }
  0xde   :  { %v151_v12 = vmul.f32 2.5257287, %v149_v8  ;;  %v194_v15 = vrot.slane %v185_v6, 7  ;;  %v200_v21 = vsel %vm199_vm1, %v188_v13, %v191_v7 }
  0xdf   :  { %v224_v16 = vadd.f32 %v223_v9, %v222_v11  ;;  %v229_v18 = vrot.slane %v219_v10, 6  ;;  %v235_v26 = vrot.slane %v225_v14, 3 }
  0xe0   :  { %v152_v19 = vmul.f32 1.442695, %v151_v12  ;;  %v202_v27 = vsel %vm201_vm6, %v200_v21, %v194_v15 }
  0xe1   :  { %v232_v23 = vrot.slane %v224_v16, 4  ;;  %v237_v25 = vsel %vm199_vm1, %v226_v17, %v229_v18  ;;  %v204_v33 = vsel %vm203_vm7, %v202_v27, %v197_v29 }
  0xe2   :  { %336 = vpow2.f32 %v152_v19  ;;  %v243_v36 = vrot.slane %v204_v33, 7 }
  0xe3   :  { %v238_v28 = vsel %vm201_vm6, %v237_v25, %v232_v23  ;;  %338 = vpow2.f32 %v205_v22 }
  0xe4   :  { %v239_v30 = vsel %vm203_vm7, %v238_v28, %v235_v26 }
  0xe5   :  { %v246_v31 = vrot.slane %v239_v30, 2 }
  0xe7   :  { %v253_v34 = vsel %vm201_vm6, %v246_v31, %v335_v32 }
  0xe8   :  { %v337_v35 = vpop.eup %336  ;;  %255 = vst [vmem:[#allocation2 + $0x8] sm:$0x7] %v253_v34 }
  0xe9   :  { %v154_v24 = vmul.f32 80.0, %v337_v35  ;;  %v339_v37 = vpop.eup %338 }
  0xeb   :  { %v248_v38 = vsel %vm199_vm1, %v154_v24, %v243_v36 }
  0xec   :  { %v250_v39 = vsel %vm249_vm8, %v248_v38, %v339_v37 }
  0xed   :  { %v252_v40 = vsel %vm251_vm9, %v250_v39, %v246_v31 }
  0xee   :  { %254 = vst [vmem:[#allocation2] sm:$0xff] %v252_v40 }
  0xef   :  { %268 = dma.vmem_to_hbm [thread:$0]  %s261_s1, 256, %s263_s10, [#allocation3], %s368_s11, %s368_s11, %s369_s12  }
  0xf0   :  { %364 = dma.done.wait [#allocation3], 256  }
  0xf1   :  { %365 = vsyncadd [#allocation3], 4294967040 }
  0xf2   :  { %273 = vsyncpa [#allocation3], 1 }

</bundles_post_ra>
